<compile_context>
chip_gen: v7x
topology: tpu7x:2x2x1
jax: 0.10.0
libtpu: 0.0.40
codegen_flags: <defaults>
</compile_context>

<pallas_src>
import jax
import jax.numpy as jnp
import numpy as np
from jax.experimental import pallas as pl
from jax.experimental.pallas import tpu as pltpu

# ---------------- sizes (small, forward-consistent) ----------------
B, S = 2, 8              # batch, source length
ENC, HID = 32, 32        # encoder_dim, hidden_dim
EMB, ATT = 16, 16        # embedding_dim, attention_dim
OUT = 24                 # output_dim (vocab)
L = 2                    # num_layers
LANES = 128              # TPU lane width; also 4*HID == 128 exactly
T_DEC = 8                # decode steps folded into one pallas_call

# ---------------- packed weight-slab row offsets (all multiples of 8) ----------------
R_WE = 0
R_WD = R_WE + ENC
R_WIH0_E = R_WD + HID
R_WIH0_C = R_WIH0_E + EMB
R_WHH0 = R_WIH0_C + ENC
R_WIH1 = R_WHH0 + HID
R_WHH1 = R_WIH1 + HID
R_WOUT_H = R_WHH1 + HID
R_WOUT_C = R_WOUT_H + HID
R_WOUT_E = R_WOUT_C + ENC
R_TOTAL = R_WOUT_E + EMB            # 288 rows x 128 lanes

# bias/vector slab row indices
V_BE, V_BD, V_WA, V_B0, V_B1, V_BOUT = 0, 1, 2, 3, 4, 5
V_ROWS = 8


def decoder_kernel(emb_ref, enc_ref, mask_ref, state_in_ref, W_ref, V_ref,
                   step_ref, state_ref, enc_t_scr):
    """One grid step == one AttentionDecoder.forward() call (eval mode)."""
    t = pl.program_id(0)

    # ---- one-time work (t == 0): seed recurrent state, hoist loop-invariant encoder proj ----
    @pl.when(t == 0)
    def _():
        state_ref[...] = state_in_ref[...]                            # [2L, B, HID]
        enc2 = enc_ref[...].reshape(B * S, ENC)                       # free: last dim unchanged
        enc_t = jnp.dot(enc2, W_ref[R_WE:R_WE + ENC, :],
                        preferred_element_type=jnp.float32) + V_ref[V_BE:V_BE + 1, :]
        enc_t_scr[...] = enc_t.reshape(B, S, LANES)                   # free: split leading dim

    emb = emb_ref[0]                                                  # [B, EMB]
    enc = enc_ref[...]                                                # [B, S, ENC]

    # ---------------- attention (ATT padded to 128 lanes; padded lanes are exactly 0) --------
    h_top = state_ref[L - 1]                                          # hidden[-1] -> [B, HID]
    dec_t = jnp.dot(h_top, W_ref[R_WD:R_WD + HID, :],
                    preferred_element_type=jnp.float32) + V_ref[V_BD:V_BD + 1, :]   # [B, 128]
    energy = jnp.tanh(enc_t_scr[...] + dec_t[:, None, :])             # [B, S, 128]
    wa = V_ref[V_WA:V_WA + 1, :]                                      # [1, 128]
    # VPU multiply + lane reduce instead of an N=1 MXU matmul.
    scores = jnp.sum(energy * wa[:, None, :], axis=-1)                # [B, S]
    # attn-Linear scalar bias shifts every score equally -> cancels in softmax (omitted).
    scores = jnp.where(mask_ref[...] != 0.0, scores, -1e10)           # masked_fill(mask==0, -1e10)
    m = jnp.max(scores, axis=-1, keepdims=True)
    e = jnp.exp(scores - m)
    d = jnp.sum(e, axis=-1, keepdims=True)
    r = pl.reciprocal(d, approx=True)                                 # EUP slot
    r = r * (2.0 - d * r)
    r = r * (2.0 - d * r)                                             # 2 Newton steps -> ~f32 exact
    attn = e * r                                                      # [B, S]
    context = jnp.sum(attn[:, :, None] * enc, axis=1)                 # [B, ENC]

    # ---------------- 2-layer LSTM, one time step (4*HID == 128 lanes) ------------------------
    def lstm_cell(gates, c_prev):
        lane = jax.lax.broadcasted_iota(jnp.int32, gates.shape, 1)
        use_tanh = (lane >= 2 * HID) & (lane < 3 * HID)               # the "g" gate block
        act = jnp.where(use_tanh, jnp.tanh(gates), jax.nn.sigmoid(gates))
        i = act[:, 0 * HID:1 * HID]
        f = act[:, 1 * HID:2 * HID]
        g = act[:, 2 * HID:3 * HID]
        o = act[:, 3 * HID:4 * HID]
        c_new = f * c_prev + i * g
        return o * jnp.tanh(c_new), c_new

    h0p, h1p = state_ref[0], state_ref[1]
    c0p, c1p = state_ref[2], state_ref[3]

    # split-weight partial matmuls replace concat([emb, context]) along the lane axis
    gates0 = (jnp.dot(emb, W_ref[R_WIH0_E:R_WIH0_E + EMB, :], preferred_element_type=jnp.float32)
              + jnp.dot(context, W_ref[R_WIH0_C:R_WIH0_C + ENC, :], preferred_element_type=jnp.float32)
              + jnp.dot(h0p, W_ref[R_WHH0:R_WHH0 + HID, :], preferred_element_type=jnp.float32)
              + V_ref[V_B0:V_B0 + 1, :])
    h0n, c0n = lstm_cell(gates0, c0p)

    gates1 = (jnp.dot(h0n, W_ref[R_WIH1:R_WIH1 + HID, :], preferred_element_type=jnp.float32)
              + jnp.dot(h1p, W_ref[R_WHH1:R_WHH1 + HID, :], preferred_element_type=jnp.float32)
              + V_ref[V_B1:V_B1 + 1, :])
    h1n, c1n = lstm_cell(gates1, c1p)

    # recurrent state stays VMEM-resident in the output block (written back to HBM once).
    state_ref[0] = h0n
    state_ref[1] = h1n
    state_ref[2] = c0n
    state_ref[3] = c1n

    # ---------------- output projection (split weights replace concat([h1, ctx, emb])) --------
    pred = (jnp.dot(h1n, W_ref[R_WOUT_H:R_WOUT_H + HID, :], preferred_element_type=jnp.float32)
            + jnp.dot(context, W_ref[R_WOUT_C:R_WOUT_C + ENC, :], preferred_element_type=jnp.float32)
            + jnp.dot(emb, W_ref[R_WOUT_E:R_WOUT_E + EMB, :], preferred_element_type=jnp.float32)
            + V_ref[V_BOUT:V_BOUT + 1, :])                            # [B, 128]; lanes OUT:128 == 0

    # packed, lane-dense per-step output slab: plane 0 = prediction, plane 1 = attention
    step_ref[:, 0:1, :, :] = pred[None, None]
    step_ref[:, 1:2, :, 0:S] = attn[None, None]


def _pad_lanes(w):
    w = jnp.asarray(w, jnp.float32)
    if w.ndim == 1:
        w = w[None, :]
    return jnp.pad(w, ((0, 0), (0, LANES - w.shape[-1])))


def pack_params(params):
    """Pack the 14 small weight/bias tensors into two lane-dense VMEM slabs (done once)."""
    Wih0, Wout = params["Wih0"], params["Wout"]
    Wmat = jnp.concatenate([
        _pad_lanes(params["We"]),            # R_WE
        _pad_lanes(params["Wd"]),            # R_WD
        _pad_lanes(Wih0[:EMB]),              # R_WIH0_E
        _pad_lanes(Wih0[EMB:EMB + ENC]),     # R_WIH0_C
        _pad_lanes(params["Whh0"]),          # R_WHH0
        _pad_lanes(params["Wih1"]),          # R_WIH1
        _pad_lanes(params["Whh1"]),          # R_WHH1
        _pad_lanes(Wout[:HID]),              # R_WOUT_H
        _pad_lanes(Wout[HID:HID + ENC]),     # R_WOUT_C
        _pad_lanes(Wout[HID + ENC:]),        # R_WOUT_E
    ], axis=0)                               # [288, 128]
    Vvec = jnp.concatenate([
        _pad_lanes(params["be"]),            # V_BE
        _pad_lanes(params["bd"]),            # V_BD
        _pad_lanes(params["wa"][:, 0]),      # V_WA  (wa transposed to a lane row)
        _pad_lanes(params["b0"]),            # V_B0
        _pad_lanes(params["b1"]),            # V_B1
        _pad_lanes(params["bout"]),          # V_BOUT
        jnp.zeros((V_ROWS - 6, LANES), jnp.float32),
    ], axis=0)                               # [8, 128]
    return {"embedding": params["embedding"], "Wmat": Wmat, "Vvec": Vvec}


def attention_decoder_decode(tokens_seq, encoder_outputs, hidden, cell, packed, mask=None):
    """Run T teacher-forced decode steps (each step == module.forward) in one pallas_call."""
    T = tokens_seq.shape[0]
    embedded = packed["embedding"][tokens_seq]               # [T, B, EMB]; dropout = identity (eval)
    if mask is None:
        mask = jnp.ones((B, S), jnp.float32)
    mask = mask.astype(jnp.float32)
    state_in = jnp.concatenate([hidden, cell], axis=0)       # [2L, B, HID]

    grid_spec = pltpu.PrefetchScalarGridSpec(
        num_scalar_prefetch=0,
        grid=(T,),
        in_specs=[
            pl.BlockSpec((1, B, EMB), lambda t: (t, 0, 0)),          # per-step embedding row
            pl.BlockSpec((B, S, ENC), lambda t: (0, 0, 0)),          # loop-invariant (one DMA)
            pl.BlockSpec((B, S), lambda t: (0, 0)),                  # mask (one DMA)
            pl.BlockSpec((2 * L, B, HID), lambda t: (0, 0, 0)),      # initial state (one DMA)
            pl.BlockSpec((R_TOTAL, LANES), lambda t: (0, 0)),        # packed matrices (one DMA)
            pl.BlockSpec((V_ROWS, LANES), lambda t: (0, 0)),         # packed biases (one DMA)
        ],
        out_specs=[
            pl.BlockSpec((1, 2, B, LANES), lambda t: (t, 0, 0, 0)),  # per-step pred+attn slab
            pl.BlockSpec((2 * L, B, HID), lambda t: (0, 0, 0)),      # final state (resident)
        ],
        scratch_shapes=[pltpu.VMEM((B, S, LANES), jnp.float32)],     # hoisted encoder projection
    )
    step_out, state_out = pl.pallas_call(
        decoder_kernel,
        grid_spec=grid_spec,
        out_shape=(
            jax.ShapeDtypeStruct((T, 2, B, LANES), jnp.float32),
            jax.ShapeDtypeStruct((2 * L, B, HID), jnp.float32),
        ),
        compiler_params=pltpu.CompilerParams(
            dimension_semantics=("arbitrary",)),  # sequential recurrence; no parallel axis at B=2
    )(embedded, encoder_outputs, mask, state_in, packed["Wmat"], packed["Vvec"])

    preds = step_out[:, 0, :, :OUT]              # [T, B, OUT]
    attns = step_out[:, 1, :, :S]                # [T, B, S]
    return preds, state_out[:L], state_out[L:], attns


# ---------------- pure-JAX reference mirroring the PyTorch forward (eval mode) ----------------
def reference_step(token, encoder_outputs, hidden, cell, params, mask):
    emb = params["embedding"][token]                                   # [B, EMB]
    enc_t = jnp.einsum("bse,ea->bsa", encoder_outputs, params["We"]) + params["be"]
    dec_t = hidden[-1] @ params["Wd"] + params["bd"]
    energy = jnp.tanh(enc_t + dec_t[:, None, :])
    scores = jnp.einsum("bsa,ao->bso", energy, params["wa"])[..., 0] + params["ba"]
    scores = jnp.where(mask != 0.0, scores, -1e10)
    attn = jax.nn.softmax(scores, axis=1)
    context = jnp.einsum("bs,bse->be", attn, encoder_outputs)

    def cell_fn(x, h, c, Wih, Whh, b):
        g = x @ Wih + h @ Whh + b
        i = jax.nn.sigmoid(g[:, :HID]); f = jax.nn.sigmoid(g[:, HID:2 * HID])
        gg = jnp.tanh(g[:, 2 * HID:3 * HID]); o = jax.nn.sigmoid(g[:, 3 * HID:])
        c_new = f * c + i * gg
        return o * jnp.tanh(c_new), c_new

    x0 = jnp.concatenate([emb, context], axis=1)
    h0, c0 = cell_fn(x0, hidden[0], cell[0], params["Wih0"], params["Whh0"], params["b0"])
    h1, c1 = cell_fn(h0, hidden[1], cell[1], params["Wih1"], params["Whh1"], params["b1"])
    pred = jnp.concatenate([h1, context, emb], axis=1) @ params["Wout"] + params["bout"]
    return pred, jnp.stack([h0, h1]), jnp.stack([c0, c1]), attn


def init_params(key):
    ks = jax.random.split(key, 16)
    u = lambda k, shape, s=0.1: jax.random.uniform(k, shape, jnp.float32, -s, s)
    return {
        "embedding": u(ks[0], (OUT, EMB)),
        # attention
        "We": u(ks[1], (ENC, ATT)), "be": u(ks[2], (ATT,)),
        "Wd": u(ks[3], (HID, ATT)), "bd": u(ks[4], (ATT,)),
        "wa": u(ks[5], (ATT, 1)),   "ba": u(ks[6], ()),
        # LSTM layer 0 (input = EMB+ENC), combined bias = bias_ih + bias_hh
        "Wih0": u(ks[7], (EMB + ENC, 4 * HID)), "Whh0": u(ks[8], (HID, 4 * HID)),
        "b0": u(ks[9], (4 * HID,)),
        # LSTM layer 1 (input = HID)
        "Wih1": u(ks[10], (HID, 4 * HID)), "Whh1": u(ks[11], (HID, 4 * HID)),
        "b1": u(ks[12], (4 * HID,)),
        # fc_out
        "Wout": u(ks[13], (HID + ENC + EMB, OUT)), "bout": u(ks[14], (OUT,)),
    }


if __name__ == "__main__":
    key = jax.random.PRNGKey(0)
    kp, kt, ke, kh, kc = jax.random.split(key, 5)

    params = init_params(kp)
    packed = pack_params(params)

    tokens_seq = jax.random.randint(kt, (T_DEC, B), 0, OUT, dtype=jnp.int32)
    encoder_outputs = jax.random.normal(ke, (B, S, ENC), jnp.float32)
    hidden = jax.random.normal(kh, (L, B, HID), jnp.float32)
    cell = jax.random.normal(kc, (L, B, HID), jnp.float32)
    # source padding mask: batch row 1 has its last 3 positions masked out
    mask = jnp.ones((B, S), jnp.float32).at[1, S - 3:].set(0.0)

    decode = jax.jit(attention_decoder_decode)
    preds, h_new, c_new, attns = decode(tokens_seq, encoder_outputs, hidden, cell, packed, mask)
    jax.block_until_ready((preds, h_new, c_new, attns))

    # correctness vs pure-JAX reference (Python loop of single decode steps)
    h, c = hidden, cell
    ref_preds, ref_attns = [], []
    for t in range(T_DEC):
        p, h, c, a = reference_step(tokens_seq[t], encoder_outputs, h, c, params, mask)
        ref_preds.append(p)
        ref_attns.append(a)
    ref_preds = jnp.stack(ref_preds)
    ref_attns = jnp.stack(ref_attns)

    assert np.allclose(preds, ref_preds, rtol=1e-3, atol=1e-4)
    assert np.allclose(attns, ref_attns, rtol=1e-3, atol=1e-4)
    assert np.allclose(h_new, h, rtol=1e-3, atol=1e-4)
    assert np.allclose(c_new, c, rtol=1e-3, atol=1e-4)

    print("KERNEL_OK")
</pallas_src>

<mosaic_0001>
module attributes {stable_mosaic.version = 11 : i64} {
  func.func @decoder_kernel(%arg0: i32, %arg1: memref<1x2x16xf32, #tpu.memory_space<vmem>>, %arg2: memref<2x8x32xf32, #tpu.memory_space<vmem>>, %arg3: memref<2x8xf32, #tpu.memory_space<vmem>>, %arg4: memref<4x2x32xf32, #tpu.memory_space<vmem>>, %arg5: memref<288x128xf32, #tpu.memory_space<vmem>>, %arg6: memref<8x128xf32, #tpu.memory_space<vmem>>, %arg7: memref<1x2x2x128xf32, #tpu.memory_space<vmem>>, %arg8: memref<4x2x32xf32, #tpu.memory_space<vmem>>, %arg9: memref<2x8x128xf32, #tpu.memory_space<vmem>>) attributes {dimension_semantics = [#tpu.dimension_semantics<arbitrary>], iteration_bounds = array<i64: 8>, scalar_prefetch = 0 : i64, scratch_operands = 1 : i64, tpu.core_type = #tpu.core_type<tc>, window_params = [{transform_indices = @transform_0, window_bounds = array<i64: 1, 2, 16>}, {pipeline_mode = #tpu.pipeline_mode<synchronous>, transform_indices = @transform_1, window_bounds = array<i64: 2, 8, 32>}, {pipeline_mode = #tpu.pipeline_mode<synchronous>, transform_indices = @transform_2, window_bounds = array<i64: 2, 8>}, {pipeline_mode = #tpu.pipeline_mode<synchronous>, transform_indices = @transform_3, window_bounds = array<i64: 4, 2, 32>}, {pipeline_mode = #tpu.pipeline_mode<synchronous>, transform_indices = @transform_4, window_bounds = array<i64: 288, 128>}, {pipeline_mode = #tpu.pipeline_mode<synchronous>, transform_indices = @transform_5, window_bounds = array<i64: 8, 128>}, {transform_indices = @transform_6, window_bounds = array<i64: 1, 2, 2, 128>}, {pipeline_mode = #tpu.pipeline_mode<synchronous>, transform_indices = @transform_7, window_bounds = array<i64: 4, 2, 32>}]} {
    %c0_i32 = arith.constant 0 : i32
    %0 = arith.cmpi eq, %arg0, %c0_i32 : i32
    %1 = arith.extui %0 : i1 to i32
    %c0_i32_0 = arith.constant 0 : i32
    %2 = arith.cmpi ne, %1, %c0_i32_0 : i32
    scf.if %2 {
      %c0_80 = arith.constant 0 : index
      %c0_81 = arith.constant 0 : index
      %c0_82 = arith.constant 0 : index
      %148 = vector.load %arg4[%c0_80, %c0_81, %c0_82] : memref<4x2x32xf32, #tpu.memory_space<vmem>>, vector<4x2x32xf32>
      %c0_83 = arith.constant 0 : index
      %c0_84 = arith.constant 0 : index
      %c0_85 = arith.constant 0 : index
      %149 = vector.load %arg8[%c0_83, %c0_84, %c0_85] : memref<4x2x32xf32, #tpu.memory_space<vmem>>, vector<4x2x32xf32>
      tpu.vector_store %arg8[%c0_83, %c0_84, %c0_85], %148 {strides = array<i32>} : memref<4x2x32xf32, #tpu.memory_space<vmem>>, vector<4x2x32xf32>,
      %c0_86 = arith.constant 0 : index
      %c0_87 = arith.constant 0 : index
      %c0_88 = arith.constant 0 : index
      %150 = vector.load %arg2[%c0_86, %c0_87, %c0_88] : memref<2x8x32xf32, #tpu.memory_space<vmem>>, vector<2x8x32xf32>
      %151 = vector.shape_cast %150 : vector<2x8x32xf32> to vector<16x32xf32>
      %c0_89 = arith.constant 0 : index
      %c0_90 = arith.constant 0 : index
      %152 = vector.load %arg5[%c0_89, %c0_90] : memref<288x128xf32, #tpu.memory_space<vmem>>, vector<32x128xf32>
      %cst_91 = arith.constant dense<0.000000e+00> : vector<16x128xf32>
      %153 = tpu.matmul %151, %152, %cst_91 {dimension_numbers = #tpu.dot_dimension_numbers<[1], [0], [0], [1], [0, 0, 1, 1], [], []>} : vector<16x32xf32>, vector<32x128xf32>, vector<16x128xf32> -> vector<16x128xf32>
      %c0_92 = arith.constant 0 : index
      %c0_93 = arith.constant 0 : index
      %154 = vector.load %arg6[%c0_92, %c0_93] : memref<8x128xf32, #tpu.memory_space<vmem>>, vector<1x128xf32>
      %155 = vector.broadcast %154 : vector<1x128xf32> to vector<16x128xf32>
      %156 = arith.addf %153, %155 : vector<16x128xf32>
      %157 = vector.shape_cast %156 : vector<16x128xf32> to vector<2x8x128xf32>
      %c0_94 = arith.constant 0 : index
      %c0_95 = arith.constant 0 : index
      %c0_96 = arith.constant 0 : index
      %158 = vector.load %arg9[%c0_94, %c0_95, %c0_96] : memref<2x8x128xf32, #tpu.memory_space<vmem>>, vector<2x8x128xf32>
      tpu.vector_store %arg9[%c0_94, %c0_95, %c0_96], %157 {strides = array<i32>} : memref<2x8x128xf32, #tpu.memory_space<vmem>>, vector<2x8x128xf32>,
    } else {
    }
    %c0 = arith.constant 0 : index
    %c0_1 = arith.constant 0 : index
    %c0_2 = arith.constant 0 : index
    %3 = vector.load %arg1[%c0, %c0_1, %c0_2] : memref<1x2x16xf32, #tpu.memory_space<vmem>>, vector<1x2x16xf32>
    %4 = vector.shape_cast %3 : vector<1x2x16xf32> to vector<2x16xf32>
    %c0_3 = arith.constant 0 : index
    %c0_4 = arith.constant 0 : index
    %c0_5 = arith.constant 0 : index
    %5 = vector.load %arg2[%c0_3, %c0_4, %c0_5] : memref<2x8x32xf32, #tpu.memory_space<vmem>>, vector<2x8x32xf32>
    %c1 = arith.constant 1 : index
    %c0_6 = arith.constant 0 : index
    %c0_7 = arith.constant 0 : index
    %6 = vector.load %arg8[%c1, %c0_6, %c0_7] : memref<4x2x32xf32, #tpu.memory_space<vmem>>, vector<1x2x32xf32>
    %7 = vector.shape_cast %6 : vector<1x2x32xf32> to vector<2x32xf32>
    %c32 = arith.constant 32 : index
    %c0_8 = arith.constant 0 : index
    %8 = vector.load %arg5[%c32, %c0_8] : memref<288x128xf32, #tpu.memory_space<vmem>>, vector<32x128xf32>
    %cst = arith.constant dense<0.000000e+00> : vector<2x128xf32>
    %9 = tpu.matmul %7, %8, %cst {dimension_numbers = #tpu.dot_dimension_numbers<[1], [0], [0], [1], [0, 0, 1, 1], [], []>} : vector<2x32xf32>, vector<32x128xf32>, vector<2x128xf32> -> vector<2x128xf32>
    %c1_9 = arith.constant 1 : index
    %c0_10 = arith.constant 0 : index
    %10 = vector.load %arg6[%c1_9, %c0_10] : memref<8x128xf32, #tpu.memory_space<vmem>>, vector<1x128xf32>
    %11 = vector.broadcast %10 : vector<1x128xf32> to vector<2x128xf32>
    %12 = arith.addf %9, %11 : vector<2x128xf32>
    %c0_11 = arith.constant 0 : index
    %c0_12 = arith.constant 0 : index
    %c0_13 = arith.constant 0 : index
    %13 = vector.load %arg9[%c0_11, %c0_12, %c0_13] : memref<2x8x128xf32, #tpu.memory_space<vmem>>, vector<2x8x128xf32>
    %14 = vector.shape_cast %12 : vector<2x128xf32> to vector<2x1x128xf32>
    %15 = vector.broadcast %14 : vector<2x1x128xf32> to vector<2x8x128xf32>
    %16 = arith.addf %13, %15 : vector<2x8x128xf32>
    %17 = math.tanh %16 : vector<2x8x128xf32>
    %c2 = arith.constant 2 : index
    %c0_14 = arith.constant 0 : index
    %18 = vector.load %arg6[%c2, %c0_14] : memref<8x128xf32, #tpu.memory_space<vmem>>, vector<1x128xf32>
    %19 = vector.shape_cast %18 : vector<1x128xf32> to vector<1x1x128xf32>
    %20 = vector.broadcast %19 : vector<1x1x128xf32> to vector<2x8x128xf32>
    %21 = arith.mulf %17, %20 : vector<2x8x128xf32>
    %cst_15 = arith.constant dense<0.000000e+00> : vector<2x8xf32>
    %22 = vector.multi_reduction <add>, %21, %cst_15 [2] : vector<2x8x128xf32> to vector<2x8xf32>
    %c0_16 = arith.constant 0 : index
    %c0_17 = arith.constant 0 : index
    %23 = vector.load %arg3[%c0_16, %c0_17] : memref<2x8xf32, #tpu.memory_space<vmem>>, vector<2x8xf32>
    %cst_18 = arith.constant 0.000000e+00 : f32
    %24 = vector.broadcast %cst_18 : f32 to vector<2x8xf32>
    %25 = arith.cmpf one, %23, %24 : vector<2x8xf32>
    %cst_19 = arith.constant -1.000000e+10 : f32
    %26 = vector.broadcast %cst_19 : f32 to vector<2x8xf32>
    %27 = arith.select %25, %22, %26 : vector<2x8xi1>, vector<2x8xf32>
    %cst_20 = arith.constant dense<0xFF800000> : vector<2xf32>
    %28 = vector.multi_reduction <maximumf>, %27, %cst_20 [1] : vector<2x8xf32> to vector<2xf32>
    %29 = vector.shape_cast %28 : vector<2xf32> to vector<2x1xf32>
    %30 = vector.broadcast %29 : vector<2x1xf32> to vector<2x8xf32>
    %31 = arith.subf %27, %30 : vector<2x8xf32>
    %32 = math.exp %31 : vector<2x8xf32>
    %cst_21 = arith.constant dense<0.000000e+00> : vector<2xf32>
    %33 = vector.multi_reduction <add>, %32, %cst_21 [1] : vector<2x8xf32> to vector<2xf32>
    %34 = vector.shape_cast %33 : vector<2xf32> to vector<2x1xf32>
    %35 = tpu.reciprocal %34 {approx = true} : vector<2x1xf32> -> vector<2x1xf32>
    %36 = arith.mulf %34, %35 : vector<2x1xf32>
    %cst_22 = arith.constant 2.000000e+00 : f32
    %37 = vector.broadcast %cst_22 : f32 to vector<2x1xf32>
    %38 = arith.subf %37, %36 : vector<2x1xf32>
    %39 = arith.mulf %35, %38 : vector<2x1xf32>
    %40 = arith.mulf %34, %39 : vector<2x1xf32>
    %cst_23 = arith.constant 2.000000e+00 : f32
    %41 = vector.broadcast %cst_23 : f32 to vector<2x1xf32>
    %42 = arith.subf %41, %40 : vector<2x1xf32>
    %43 = arith.mulf %39, %42 : vector<2x1xf32>
    %44 = vector.broadcast %43 : vector<2x1xf32> to vector<2x8xf32>
    %45 = arith.mulf %32, %44 : vector<2x8xf32>
    %46 = vector.shape_cast %45 : vector<2x8xf32> to vector<2x8x1xf32>
    %47 = vector.broadcast %46 : vector<2x8x1xf32> to vector<2x8x32xf32>
    %48 = arith.mulf %47, %5 : vector<2x8x32xf32>
    %cst_24 = arith.constant dense<0.000000e+00> : vector<2x32xf32>
    %49 = vector.multi_reduction <add>, %48, %cst_24 [1] : vector<2x8x32xf32> to vector<2x32xf32>
    %c0_25 = arith.constant 0 : index
    %c0_26 = arith.constant 0 : index
    %c0_27 = arith.constant 0 : index
    %50 = vector.load %arg8[%c0_25, %c0_26, %c0_27] : memref<4x2x32xf32, #tpu.memory_space<vmem>>, vector<1x2x32xf32>
    %51 = vector.shape_cast %50 : vector<1x2x32xf32> to vector<2x32xf32>
    %c1_28 = arith.constant 1 : index
    %c0_29 = arith.constant 0 : index
    %c0_30 = arith.constant 0 : index
    %52 = vector.load %arg8[%c1_28, %c0_29, %c0_30] : memref<4x2x32xf32, #tpu.memory_space<vmem>>, vector<1x2x32xf32>
    %53 = vector.shape_cast %52 : vector<1x2x32xf32> to vector<2x32xf32>
    %c2_31 = arith.constant 2 : index
    %c0_32 = arith.constant 0 : index
    %c0_33 = arith.constant 0 : index
    %54 = vector.load %arg8[%c2_31, %c0_32, %c0_33] : memref<4x2x32xf32, #tpu.memory_space<vmem>>, vector<1x2x32xf32>
    %55 = vector.shape_cast %54 : vector<1x2x32xf32> to vector<2x32xf32>
    %c3 = arith.constant 3 : index
    %c0_34 = arith.constant 0 : index
    %c0_35 = arith.constant 0 : index
    %56 = vector.load %arg8[%c3, %c0_34, %c0_35] : memref<4x2x32xf32, #tpu.memory_space<vmem>>, vector<1x2x32xf32>
    %57 = vector.shape_cast %56 : vector<1x2x32xf32> to vector<2x32xf32>
    %c64 = arith.constant 64 : index
    %c0_36 = arith.constant 0 : index
    %58 = vector.load %arg5[%c64, %c0_36] : memref<288x128xf32, #tpu.memory_space<vmem>>, vector<16x128xf32>
    %cst_37 = arith.constant dense<0.000000e+00> : vector<2x128xf32>
    %59 = tpu.matmul %4, %58, %cst_37 {dimension_numbers = #tpu.dot_dimension_numbers<[1], [0], [0], [1], [0, 0, 1, 1], [], []>} : vector<2x16xf32>, vector<16x128xf32>, vector<2x128xf32> -> vector<2x128xf32>
    %c80 = arith.constant 80 : index
    %c0_38 = arith.constant 0 : index
    %60 = vector.load %arg5[%c80, %c0_38] : memref<288x128xf32, #tpu.memory_space<vmem>>, vector<32x128xf32>
    %cst_39 = arith.constant dense<0.000000e+00> : vector<2x128xf32>
    %61 = tpu.matmul %49, %60, %cst_39 {dimension_numbers = #tpu.dot_dimension_numbers<[1], [0], [0], [1], [0, 0, 1, 1], [], []>} : vector<2x32xf32>, vector<32x128xf32>, vector<2x128xf32> -> vector<2x128xf32>
    %62 = arith.addf %59, %61 : vector<2x128xf32>
    %c112 = arith.constant 112 : index
    %c0_40 = arith.constant 0 : index
    %63 = vector.load %arg5[%c112, %c0_40] : memref<288x128xf32, #tpu.memory_space<vmem>>, vector<32x128xf32>
    %cst_41 = arith.constant dense<0.000000e+00> : vector<2x128xf32>
    %64 = tpu.matmul %51, %63, %cst_41 {dimension_numbers = #tpu.dot_dimension_numbers<[1], [0], [0], [1], [0, 0, 1, 1], [], []>} : vector<2x32xf32>, vector<32x128xf32>, vector<2x128xf32> -> vector<2x128xf32>
    %65 = arith.addf %62, %64 : vector<2x128xf32>
    %c3_42 = arith.constant 3 : index
    %c0_43 = arith.constant 0 : index
    %66 = vector.load %arg6[%c3_42, %c0_43] : memref<8x128xf32, #tpu.memory_space<vmem>>, vector<1x128xf32>
    %67 = vector.broadcast %66 : vector<1x128xf32> to vector<2x128xf32>
    %68 = arith.addf %65, %67 : vector<2x128xf32>
    %69 = tpu.iota {dimensions = array<i32: 1>} : vector<2x128xi32>
    %c64_i32 = arith.constant 64 : i32
    %70 = vector.broadcast %c64_i32 : i32 to vector<2x128xi32>
    %71 = arith.cmpi sge, %69, %70 : vector<2x128xi32>
    %c96_i32 = arith.constant 96 : i32
    %72 = vector.broadcast %c96_i32 : i32 to vector<2x128xi32>
    %73 = arith.cmpi slt, %69, %72 : vector<2x128xi32>
    %74 = arith.andi %71, %73 : vector<2x128xi1>
    %75 = math.tanh %68 : vector<2x128xf32>
    %76 = arith.negf %68 : vector<2x128xf32>
    %77 = math.exp %76 : vector<2x128xf32>
    %cst_44 = arith.constant 1.000000e+00 : f32
    %78 = vector.broadcast %cst_44 : f32 to vector<2x128xf32>
    %79 = arith.addf %78, %77 : vector<2x128xf32>
    %80 = arith.divf %78, %79 : vector<2x128xf32>
    %81 = arith.select %74, %75, %80 : vector<2x128xi1>, vector<2x128xf32>
    %82 = vector.extract_strided_slice %81 {offsets = [0, 0], sizes = [2, 32], strides = [1, 1]} : vector<2x128xf32> to vector<2x32xf32>
    %83 = vector.extract_strided_slice %81 {offsets = [0, 32], sizes = [2, 32], strides = [1, 1]} : vector<2x128xf32> to vector<2x32xf32>
    %84 = vector.extract_strided_slice %81 {offsets = [0, 64], sizes = [2, 32], strides = [1, 1]} : vector<2x128xf32> to vector<2x32xf32>
    %85 = vector.extract_strided_slice %81 {offsets = [0, 96], sizes = [2, 32], strides = [1, 1]} : vector<2x128xf32> to vector<2x32xf32>
    %86 = arith.mulf %83, %55 : vector<2x32xf32>
    %87 = arith.mulf %82, %84 : vector<2x32xf32>
    %88 = arith.addf %86, %87 : vector<2x32xf32>
    %89 = math.tanh %88 : vector<2x32xf32>
    %90 = arith.mulf %85, %89 : vector<2x32xf32>
    %c144 = arith.constant 144 : index
    %c0_45 = arith.constant 0 : index
    %91 = vector.load %arg5[%c144, %c0_45] : memref<288x128xf32, #tpu.memory_space<vmem>>, vector<32x128xf32>
    %cst_46 = arith.constant dense<0.000000e+00> : vector<2x128xf32>
    %92 = tpu.matmul %90, %91, %cst_46 {dimension_numbers = #tpu.dot_dimension_numbers<[1], [0], [0], [1], [0, 0, 1, 1], [], []>} : vector<2x32xf32>, vector<32x128xf32>, vector<2x128xf32> -> vector<2x128xf32>
    %c176 = arith.constant 176 : index
    %c0_47 = arith.constant 0 : index
    %93 = vector.load %arg5[%c176, %c0_47] : memref<288x128xf32, #tpu.memory_space<vmem>>, vector<32x128xf32>
    %cst_48 = arith.constant dense<0.000000e+00> : vector<2x128xf32>
    %94 = tpu.matmul %53, %93, %cst_48 {dimension_numbers = #tpu.dot_dimension_numbers<[1], [0], [0], [1], [0, 0, 1, 1], [], []>} : vector<2x32xf32>, vector<32x128xf32>, vector<2x128xf32> -> vector<2x128xf32>
    %95 = arith.addf %92, %94 : vector<2x128xf32>
    %c4 = arith.constant 4 : index
    %c0_49 = arith.constant 0 : index
    %96 = vector.load %arg6[%c4, %c0_49] : memref<8x128xf32, #tpu.memory_space<vmem>>, vector<1x128xf32>
    %97 = vector.broadcast %96 : vector<1x128xf32> to vector<2x128xf32>
    %98 = arith.addf %95, %97 : vector<2x128xf32>
    %99 = tpu.iota {dimensions = array<i32: 1>} : vector<2x128xi32>
    %c64_i32_50 = arith.constant 64 : i32
    %100 = vector.broadcast %c64_i32_50 : i32 to vector<2x128xi32>
    %101 = arith.cmpi sge, %99, %100 : vector<2x128xi32>
    %c96_i32_51 = arith.constant 96 : i32
    %102 = vector.broadcast %c96_i32_51 : i32 to vector<2x128xi32>
    %103 = arith.cmpi slt, %99, %102 : vector<2x128xi32>
    %104 = arith.andi %101, %103 : vector<2x128xi1>
    %105 = math.tanh %98 : vector<2x128xf32>
    %106 = arith.negf %98 : vector<2x128xf32>
    %107 = math.exp %106 : vector<2x128xf32>
    %cst_52 = arith.constant 1.000000e+00 : f32
    %108 = vector.broadcast %cst_52 : f32 to vector<2x128xf32>
    %109 = arith.addf %108, %107 : vector<2x128xf32>
    %110 = arith.divf %108, %109 : vector<2x128xf32>
    %111 = arith.select %104, %105, %110 : vector<2x128xi1>, vector<2x128xf32>
    %112 = vector.extract_strided_slice %111 {offsets = [0, 0], sizes = [2, 32], strides = [1, 1]} : vector<2x128xf32> to vector<2x32xf32>
    %113 = vector.extract_strided_slice %111 {offsets = [0, 32], sizes = [2, 32], strides = [1, 1]} : vector<2x128xf32> to vector<2x32xf32>
    %114 = vector.extract_strided_slice %111 {offsets = [0, 64], sizes = [2, 32], strides = [1, 1]} : vector<2x128xf32> to vector<2x32xf32>
    %115 = vector.extract_strided_slice %111 {offsets = [0, 96], sizes = [2, 32], strides = [1, 1]} : vector<2x128xf32> to vector<2x32xf32>
    %116 = arith.mulf %113, %57 : vector<2x32xf32>
    %117 = arith.mulf %112, %114 : vector<2x32xf32>
    %118 = arith.addf %116, %117 : vector<2x32xf32>
    %119 = math.tanh %118 : vector<2x32xf32>
    %120 = arith.mulf %115, %119 : vector<2x32xf32>
    %c0_53 = arith.constant 0 : index
    %c0_54 = arith.constant 0 : index
    %c0_55 = arith.constant 0 : index
    %121 = vector.load %arg8[%c0_53, %c0_54, %c0_55] : memref<4x2x32xf32, #tpu.memory_space<vmem>>, vector<1x2x32xf32>
    %122 = vector.shape_cast %121 : vector<1x2x32xf32> to vector<2x32xf32>
    %123 = vector.shape_cast %90 : vector<2x32xf32> to vector<1x2x32xf32>
    tpu.vector_store %arg8[%c0_53, %c0_54, %c0_55], %123 {strides = array<i32>} : memref<4x2x32xf32, #tpu.memory_space<vmem>>, vector<1x2x32xf32>,
    %c1_56 = arith.constant 1 : index
    %c0_57 = arith.constant 0 : index
    %c0_58 = arith.constant 0 : index
    %124 = vector.load %arg8[%c1_56, %c0_57, %c0_58] : memref<4x2x32xf32, #tpu.memory_space<vmem>>, vector<1x2x32xf32>
    %125 = vector.shape_cast %124 : vector<1x2x32xf32> to vector<2x32xf32>
    %126 = vector.shape_cast %120 : vector<2x32xf32> to vector<1x2x32xf32>
    tpu.vector_store %arg8[%c1_56, %c0_57, %c0_58], %126 {strides = array<i32>} : memref<4x2x32xf32, #tpu.memory_space<vmem>>, vector<1x2x32xf32>,
    %c2_59 = arith.constant 2 : index
    %c0_60 = arith.constant 0 : index
    %c0_61 = arith.constant 0 : index
    %127 = vector.load %arg8[%c2_59, %c0_60, %c0_61] : memref<4x2x32xf32, #tpu.memory_space<vmem>>, vector<1x2x32xf32>
    %128 = vector.shape_cast %127 : vector<1x2x32xf32> to vector<2x32xf32>
    %129 = vector.shape_cast %88 : vector<2x32xf32> to vector<1x2x32xf32>
    tpu.vector_store %arg8[%c2_59, %c0_60, %c0_61], %129 {strides = array<i32>} : memref<4x2x32xf32, #tpu.memory_space<vmem>>, vector<1x2x32xf32>,
    %c3_62 = arith.constant 3 : index
    %c0_63 = arith.constant 0 : index
    %c0_64 = arith.constant 0 : index
    %130 = vector.load %arg8[%c3_62, %c0_63, %c0_64] : memref<4x2x32xf32, #tpu.memory_space<vmem>>, vector<1x2x32xf32>
    %131 = vector.shape_cast %130 : vector<1x2x32xf32> to vector<2x32xf32>
    %132 = vector.shape_cast %118 : vector<2x32xf32> to vector<1x2x32xf32>
    tpu.vector_store %arg8[%c3_62, %c0_63, %c0_64], %132 {strides = array<i32>} : memref<4x2x32xf32, #tpu.memory_space<vmem>>, vector<1x2x32xf32>,
    %c208 = arith.constant 208 : index
    %c0_65 = arith.constant 0 : index
    %133 = vector.load %arg5[%c208, %c0_65] : memref<288x128xf32, #tpu.memory_space<vmem>>, vector<32x128xf32>
    %cst_66 = arith.constant dense<0.000000e+00> : vector<2x128xf32>
    %134 = tpu.matmul %120, %133, %cst_66 {dimension_numbers = #tpu.dot_dimension_numbers<[1], [0], [0], [1], [0, 0, 1, 1], [], []>} : vector<2x32xf32>, vector<32x128xf32>, vector<2x128xf32> -> vector<2x128xf32>
    %c240 = arith.constant 240 : index
    %c0_67 = arith.constant 0 : index
    %135 = vector.load %arg5[%c240, %c0_67] : memref<288x128xf32, #tpu.memory_space<vmem>>, vector<32x128xf32>
    %cst_68 = arith.constant dense<0.000000e+00> : vector<2x128xf32>
    %136 = tpu.matmul %49, %135, %cst_68 {dimension_numbers = #tpu.dot_dimension_numbers<[1], [0], [0], [1], [0, 0, 1, 1], [], []>} : vector<2x32xf32>, vector<32x128xf32>, vector<2x128xf32> -> vector<2x128xf32>
    %137 = arith.addf %134, %136 : vector<2x128xf32>
    %c272 = arith.constant 272 : index
    %c0_69 = arith.constant 0 : index
    %138 = vector.load %arg5[%c272, %c0_69] : memref<288x128xf32, #tpu.memory_space<vmem>>, vector<16x128xf32>
    %cst_70 = arith.constant dense<0.000000e+00> : vector<2x128xf32>
    %139 = tpu.matmul %4, %138, %cst_70 {dimension_numbers = #tpu.dot_dimension_numbers<[1], [0], [0], [1], [0, 0, 1, 1], [], []>} : vector<2x16xf32>, vector<16x128xf32>, vector<2x128xf32> -> vector<2x128xf32>
    %140 = arith.addf %137, %139 : vector<2x128xf32>
    %c5 = arith.constant 5 : index
    %c0_71 = arith.constant 0 : index
    %141 = vector.load %arg6[%c5, %c0_71] : memref<8x128xf32, #tpu.memory_space<vmem>>, vector<1x128xf32>
    %142 = vector.broadcast %141 : vector<1x128xf32> to vector<2x128xf32>
    %143 = arith.addf %140, %142 : vector<2x128xf32>
    %144 = vector.shape_cast %143 : vector<2x128xf32> to vector<1x1x2x128xf32>
    %c0_72 = arith.constant 0 : index
    %c0_73 = arith.constant 0 : index
    %c0_74 = arith.constant 0 : index
    %c0_75 = arith.constant 0 : index
    %145 = vector.load %arg7[%c0_72, %c0_73, %c0_74, %c0_75] : memref<1x2x2x128xf32, #tpu.memory_space<vmem>>, vector<1x1x2x128xf32>
    tpu.vector_store %arg7[%c0_72, %c0_73, %c0_74, %c0_75], %144 {strides = array<i32>} : memref<1x2x2x128xf32, #tpu.memory_space<vmem>>, vector<1x1x2x128xf32>,
    %146 = vector.shape_cast %45 : vector<2x8xf32> to vector<1x1x2x8xf32>
    %c0_76 = arith.constant 0 : index
    %c1_77 = arith.constant 1 : index
    %c0_78 = arith.constant 0 : index
    %c0_79 = arith.constant 0 : index
    %147 = vector.load %arg7[%c0_76, %c1_77, %c0_78, %c0_79] : memref<1x2x2x128xf32, #tpu.memory_space<vmem>>, vector<1x1x2x8xf32>
    tpu.vector_store %arg7[%c0_76, %c1_77, %c0_78, %c0_79], %146 {strides = array<i32>} : memref<1x2x2x128xf32, #tpu.memory_space<vmem>>, vector<1x1x2x8xf32>,
    return
  }
  func.func @transform_0(%arg0: i32) -> (i32, i32, i32) {
    %c0_i32 = arith.constant 0 : i32
    %c0_i32_0 = arith.constant 0 : i32
    %c0_i32_1 = arith.constant 0 : i32
    return %arg0, %c0_i32, %c0_i32_0 : i32, i32, i32
  }
  func.func @transform_1(%arg0: i32) -> (i32, i32, i32) {
    %c0_i32 = arith.constant 0 : i32
    %c0_i32_0 = arith.constant 0 : i32
    %c0_i32_1 = arith.constant 0 : i32
    %c0_i32_2 = arith.constant 0 : i32
    return %c0_i32, %c0_i32_0, %c0_i32_1 : i32, i32, i32
  }
  func.func @transform_2(%arg0: i32) -> (i32, i32) {
    %c0_i32 = arith.constant 0 : i32
    %c0_i32_0 = arith.constant 0 : i32
    %c0_i32_1 = arith.constant 0 : i32
    return %c0_i32, %c0_i32_0 : i32, i32
  }
  func.func @transform_3(%arg0: i32) -> (i32, i32, i32) {
    %c0_i32 = arith.constant 0 : i32
    %c0_i32_0 = arith.constant 0 : i32
    %c0_i32_1 = arith.constant 0 : i32
    %c0_i32_2 = arith.constant 0 : i32
    return %c0_i32, %c0_i32_0, %c0_i32_1 : i32, i32, i32
  }
  func.func @transform_4(%arg0: i32) -> (i32, i32) {
    %c0_i32 = arith.constant 0 : i32
    %c0_i32_0 = arith.constant 0 : i32
    %c0_i32_1 = arith.constant 0 : i32
    return %c0_i32, %c0_i32_0 : i32, i32
  }
  func.func @transform_5(%arg0: i32) -> (i32, i32) {
    %c0_i32 = arith.constant 0 : i32
    %c0_i32_0 = arith.constant 0 : i32
    %c0_i32_1 = arith.constant 0 : i32
    return %c0_i32, %c0_i32_0 : i32, i32
  }
  func.func @transform_6(%arg0: i32) -> (i32, i32, i32, i32) {
    %c0_i32 = arith.constant 0 : i32
    %c0_i32_0 = arith.constant 0 : i32
    %c0_i32_1 = arith.constant 0 : i32
    %c0_i32_2 = arith.constant 0 : i32
    return %arg0, %c0_i32, %c0_i32_0, %c0_i32_1 : i32, i32, i32, i32
  }
  func.func @transform_7(%arg0: i32) -> (i32, i32, i32) {
    %c0_i32 = arith.constant 0 : i32
    %c0_i32_0 = arith.constant 0 : i32
    %c0_i32_1 = arith.constant 0 : i32
    %c0_i32_2 = arith.constant 0 : i32
    return %c0_i32, %c0_i32_0, %c0_i32_1 : i32, i32, i32
  }
}

</mosaic_0001>

<bundles_post_ra>
// kernel: attention_decoder_decode.1
= control target key start
LH: loop header
LB: loop body
LE: loop exit
PB: predicated region body
PF: predicated region fallthrough
CT: control target
= control target key end

     0   :  { %13 = vsyncpa [#allocation4], 0  ;;  %s1775_s24 = smov 0   ;;  %s2027_s0 = inlined_call_operand.vmem [shape: f32[8,2,16], index: 0, kind: input, shape index: {}]   ;;  %s2028_s1 = inlined_call_operand.vmem [shape: f32[2,8,32], index: 1, kind: input, shape index: {}]   ;;  %s2029_s2 = inlined_call_operand.vmem [shape: f32[2,8], index: 2, kind: input, shape index: {}]   ;;  %s2030_s3 = inlined_call_operand.vmem [shape: f32[4,2,32], index: 3, kind: input, shape index: {}]   ;;  %s2031_s4 = inlined_call_operand.hbm [shape: f32[288,128], index: 4, kind: input, shape index: {}]   ;;  %s2032_s5 = inlined_call_operand.vmem [shape: f32[8,128], index: 5, kind: input, shape index: {}]   ;;  %s2033_s6 = inlined_call_operand.vmem [shape: f32[8,2,2,128], index: 6, kind: output, shape index: {0}]   ;;  %s2034_s7 = inlined_call_operand.vmem [shape: f32[4,2,32], index: 7, kind: output, shape index: {1}]  }
   0x1 LB: > { %s1781_s25 = sadd.s32 4294967295, %s1723_s24   ;;  %p1390_p0 = scmp.ge.s32.totalorder %s1723_s24, 1  ;;  %s1723_s24 = sphi %s1775_s24, %s19_s24  }
   0x2   : > { %p202_p1 = scmp.lt.s32.totalorder %s1723_s24, 9  ;;  %s1725_s26 = smov [#allocation3]  }
   0x3   : > { %s223_s27 = sshll.u32 %s1725_s26, 4  ;;  %p2035_p4 = scmp.eq.s32.totalorder %s1781_s25, 0  ;;  %s224_s27 = int_to_ptr.vmem [resolvable:$true] %s223_s27 }
   0x4   : > { %p1786_p3 = pnand %p1390_p0, %p202_p1  ;;  %s1685_s9 = scalar_lea.hbm %s2031_s4, 4608 }
   0x5   : > { %p1686_p7 = scmp.ne.s32.totalorder %s2031_s4, %s1685_s9  ;;  %p1692_p11 = scmp.lt.u32.totalorder %s1685_s9, %s2031_s4 }
   0x6   : > { %s2037_s28 = scalar_select %p1786_p3, 1, 0 }
   0x7   : > { %p1637_p5 = pneg %p1786_p3 }
   0x9   : > { %p1795_p6 = pnand %p2035_p4, %p1637_p5 }
   0xb   : > { %p1687_p8 = pneg %p1795_p6 }
   0xd   : > { %p1688_p9 = pnand %p1687_p8, %p1686_p7 }
   0xf   : > { %p1689_p10 = pneg %p1688_p9 }
  0x11   : > { %p1694_p12 = pnand %p1692_p11, %p1689_p10 }
  0x13   : > { %1697 = shalt.err (!%p1694_p12)
}
  0x14   : > { %s1698_s14 = scalar_lea.vmem %s224_s27, 4608  ;;  %p1706_p5 = scmp.lt.s32.totalorder %s224_s27, %s224_s27 }
  0x15   : > { %p1699_p13 = scmp.ne.s32.totalorder %s224_s27, %s1698_s14  ;;  %p1707_p2 = scmp.lt.s32.totalorder %s1698_s14, %s1698_s14 }
  0x17   : > { %p1701_p0 = pnand %p1699_p13, %p1687_p8  ;;  %p1708_p4 = por %p1707_p2, %p1706_p5 }
  0x19   : > { %p1702_p1 = pneg %p1701_p0 }
  0x1b   : > { %p1709_p3 = pnand %p1708_p4, %p1702_p1 }
  0x1d   : > { %1712 = shalt.err (!%p1709_p3)
}
  0x1e   : > { %s1726_s15 = smov 128   ;;  %s1727_s16 = smov 8  }
  0x1f   : > { %1640 = dma.hbm_to_vmem [thread:$0]  (!%p1795_p6), %s2031_s4, 4608, %s224_s27, [#allocation4], %s1726_s15, %s1726_s15, %s1727_s16  }
  0x20   : > { %p2039_p7 = scmp.ne.s32.totalorder %s2037_s28, 0 }
  0x21   : > { %p2040_p9 = scmp.eq.s32.totalorder (!%p2039_p7), %s1781_s25, 0 }
  0x22   : > { %249 = sbr.rel (%p2039_p7) target bundleno = 2794 (0xaea), region = 44 }
  0x29   : > { %1718 = dma.done.wait (%p2040_p9), [#allocation4], 4608   ;;  %p2041_p8 = pmov %p2040_p9 }
  0x2a   : > { %p280_p2 = scmp.lt.s32.totalorder %s1781_s25, 7  ;;  %p2042_p3 = scmp.ne.s32.totalorder %s1781_s25, 0 }
  0x2b   : > { %1720 = vsyncadd (%p2041_p8), [#allocation4], 4294962688  ;;  %v293_v0 = vld [vmem:[%s2030_s3] sm:$0x3] (!%p2042_p3)  ;;  %v294_v1 = vld [vmem:[%s2030_s3 + $0x2] sm:$0x3] (!%p2042_p3) }
  0x2c   : > { %s281_s19 = scalar_select %p280_p2, %s1781_s25, 7 }
  0x2d   : > { %292 = sbr.rel (%p2042_p3) target bundleno = 273 (0x111), region = 52  ;;  %v295_v2 = vld [vmem:[%s2030_s3 + $0x4] sm:$0x3] (!%p2042_p3)  ;;  %v296_v3 = vld [vmem:[%s2030_s3 + $0x6] sm:$0x3] (!%p2042_p3)  ;;  %vm297_vm0 = vcmask (!%p2042_p3), 254976  }
  0x2e   : > { %s1395_s20 = sshll.u32 %s281_s19, 1  ;;  %s1427_s21 = sshll.u32 %s281_s19, 2  ;;  %v304_v4 = vld [vmem:[#allocation3] sm:$0xff] (!%p2042_p3)  ;;  %v305_v5 = vld [vmem:[#allocation3 + $0x8] sm:$0xff] (!%p2042_p3)  ;;  %vm313_vm1 = vcmask (!%p2042_p3), 261120   ;;  %v306_v7 = vld [vmem:[#allocation3 + $0x10] sm:$0xff] (!%p2042_p3) }
  0x2f   : > { %s1826_s26 = scalar_lea.vmem %s2027_s0, %s1395_s20  ;;  %s1831_s29 = scalar_lea.vmem %s2033_s6, %s1427_s21  ;;  %298 = vst.msk [vmem:[%s2034_s7] sm:$0x3] (!%p2042_p3), %vm297_vm0, %v293_v0  ;;  %299 = vst.msk [vmem:[%s2034_s7 + $0x2] sm:$0x3] (!%p2042_p3), %vm297_vm0, %v294_v1  ;;  %v1577_v6 = vpack.c.bf16 (!%p2042_p3), %v305_v5, %v304_v4  ;;  %v307_v8 = vld [vmem:[#allocation3 + $0x18] sm:$0xff] (!%p2042_p3)  ;;  %v302_v9 = vld [vmem:[%s2028_s1] sm:$0xff] (!%p2042_p3) }
  0x30   : > { %300 = vst.msk [vmem:[%s2034_s7 + $0x4] sm:$0x3] (!%p2042_p3), %vm297_vm0, %v295_v2  ;;  %301 = vst.msk [vmem:[%s2034_s7 + $0x6] sm:$0x3] (!%p2042_p3), %vm297_vm0, %v296_v3  ;;  %v1581_v10 = vpack.c.bf16 (!%p2042_p3), %v307_v8, %v306_v7  ;;  %1483 = vmatprep.mubr.msk.f32.mxu0 (!%p2042_p3), %vm313_vm1, %v302_v9  ;;  %v303_v11 = vld [vmem:[%s2028_s1 + $0x8] sm:$0xff] (!%p2042_p3) }
  0x31   : > { %1578 = vmatprep.subr.bf16.mxu0 (!%p2042_p3), %v1577_v6  ;;  %v1399_v12 = vld [vmem:[%s2032_s5] ss:$0 sm:$0xff] (!%p2042_p3) }
  0x32   : > { %1580 = vmatpush3.bf16.msra.mxu0 (!%p2042_p3), %v1577_v6 }
  0x33   : > { %1582 = vmatprep.subr.bf16.mxu0 (!%p2042_p3), %v1581_v10 }
  0x36   : > { %1584 = vmatpush3.bf16.msra.mxu0 %v1581_v10 }
  0x39   : > { %1484 = vmatmul.mubr.msk.f32.vlgmr.msra.gmra.mrb[0].mxu0 %vm313_vm1, %v303_v11 }
 0x10c   : > { %v1485_v13 = vpop.f32.mrb[0].mxu0 }
 0x10d   : > { %v392_v14 = vadd.f32 %v1485_v13, %v1399_v12  ;;  %v386_v15 = vpop.f32.mrb[1].mxu0 }
 0x10e   : > { %v387_v16 = vadd.f32 %v1399_v12, %v386_v15 }
 0x10f   : > { %396 = vst [vmem:[#allocation2 + $0x8] sm:$0xff] %v392_v14 }
 0x110   : > { %395 = vst [vmem:[#allocation2] sm:$0xff] %v387_v16 }
 0x111 PF: > { %v402_v17 = vld [vmem:[#allocation3 + $0x20] sm:$0xff]  ;;  %v403_v18 = vld [vmem:[#allocation3 + $0x28] sm:$0xff]  ;;  %v404_v19 = vld [vmem:[#allocation3 + $0x30] sm:$0xff]  ;;  %v1728_v20 = vmov 0.0|0.0   ;;  %vm1729_vm2 = vmmov 0   ;;  %v1730_v23 = vmov 0.0   ;;  %v491_v28 = vlaneseq }
 0x112   : > { %1585 = vmatprep.subr.bf16.mxu0 %v1728_v20  ;;  %v1586_v21 = vpack.c.bf16 %v403_v18, %v402_v17  ;;  %v405_v22 = vld [vmem:[#allocation3 + $0x38] sm:$0xff]  ;;  %1494 = vmatprep.mubr.msk.f32.mxu0 %vm1729_vm2, %v1730_v23  ;;  %vm411_vm3 = vcmask 261120   ;;  %v1731_v26 = vmov 1966171168   ;;  %v1403_v31 = vld [vmem:[%s2032_s5 + $0x1] ss:$0 sm:$0xff] }
 0x113   : > { %1591 = vmatprep.subr.bf16.mxu1 %v1728_v20  ;;  %1505 = vmatprep.mubr.msk.f32.mxu1 %vm1729_vm2, %v1730_v23  ;;  %v1589_v24 = vpack.c.bf16 %v405_v22, %v404_v19  ;;  %v1880_v25 = vld [vmem:[%s2034_s7 + $0x2] sm:$0x3]  ;;  %v489_v27 = vunpack.c.l.s4 %v1731_v26  ;;  %v1887_v30 = vshrl.u32 %v491_v28, 7  ;;  %v1901_v52 = vand.u32 127, %v491_v28  ;;  %v535_v55 = vld [vmem:[%s2029_s2] sm:$0x3] }
 0x114   : > { %1587 = vmatpush3.bf16.msra.mxu0 %v1586_v21  ;;  %v1405_v47 = vld [vmem:[%s2032_s5 + $0x2] ss:$0 sm:$0xff]  ;;  %vm549_vm4 = vcmask 1041409   ;;  %vm536_vm5 = vcmp.ne.f32.partialorder %v535_v55, 0.0  ;;  %vm553_vm6 = vcmask 58368   ;;  %v606_v3 = vld [vmem:[#allocation3 + $0x40] sm:$0xff] }
 0x115   : > { %1588 = vmatprep.subr.bf16.mxu0 %v1728_v20  ;;  %v490_v29 = vunpack.c.0.s8 %v489_v27  ;;  %v1894_v37 = vsub.s32 0, %v1887_v30  ;;  %v543_v54 = vsub.s32 %v1901_v52, %v1887_v30  ;;  %v607_v4 = vld [vmem:[#allocation3 + $0x48] sm:$0xff]  ;;  %v881_v9 = vld [vmem:[#allocation3 + $0xb0] sm:$0xff]  ;;  %v882_v10 = vld [vmem:[#allocation3 + $0xb8] sm:$0xff]  ;;  %vm687_vm7 = vcmask 130048   ;;  %s1732_s23 = smov 64  }
 0x116   : > { %v486_v43 = vld [vmem:[#allocation2 + $0x8] sm:$0xff]  ;;  %v1598_v5 = vpack.c.bf16 %v607_v4, %v606_v3  ;;  %v1607_v12 = vpack.c.bf16 %v882_v10, %v881_v9  ;;  %v1913_v13 = vld [vmem:[%s1826_s26] sm:$0x3]  ;;  %v883_v15 = vld [vmem:[#allocation3 + $0xc0] sm:$0xff]  ;;  %vm845_vm8 = vcmp.ge.s32.totalorder %v1901_v52, 64  ;;  %vm846_vm9 = vcmp.lt.s32.totalorder %v1901_v52, 96 }
 0x117   : > { %v493_v32 = vsub.s32 %v490_v29, %v1887_v30  ;;  %v485_v40 = vld [vmem:[#allocation2] sm:$0xff]  ;;  %v884_v16 = vld [vmem:[#allocation3 + $0xc8] sm:$0xff]  ;;  %v609_v22 = vld [vmem:[#allocation3 + $0x58] sm:$0xff]  ;;  %v580_v29 = vsub.s32 1, %v1887_v30  ;;  %s1733_s30 = smov 32   ;;  %vm1066_vm11 = vcmask 254976  }
 0x118   : > { %1590 = vmatpush3.bf16.msra.mxu0 %v1589_v24  ;;  %v1610_v18 = vpack.c.bf16 %v884_v16, %v883_v15  ;;  %v608_v21 = vld [vmem:[#allocation3 + $0x50] sm:$0xff]  ;;  %v1088_v27 = vld [vmem:[#allocation3 + $0xf8] sm:$0xff]  ;;  %vm1963_vm10 = vmand %vm845_vm8, %vm846_vm9  ;;  %s1734_s14 = smov 96  }
 0x119   : > { %1597 = vmatprep.subr.bf16.mxu0 %v1728_v20  ;;  %v1592_v24 = vpack.c.bf16 %v609_v22, %v608_v21  ;;  %v1087_v26 = vld [vmem:[#allocation3 + $0xf0] sm:$0xff] }
 0x11a   : > { %v601_v3 = vld [vmem:[%s2034_s7] sm:$0x3]  ;;  %v1411_v15 = vld [vmem:[%s2032_s5 + $0x3] ss:$0 sm:$0xff] }
 0x11b   : > { %1495 = vmatmul.mubr.msk.f32.vlgmr.msra.gmra.mrb[0].mxu0 %vm411_vm3, %v1880_v25  ;;  %1593 = vmatpush3.bf16.msra.mxu1 %v1592_v24 }
 0x11c   : > { %1512 = vmatprep.mubr.msk.f32.mxu0 %vm1729_vm2, %v1730_v23  ;;  %1599 = vmatpush3.bf16.msra.mxu0 %v1598_v5 }
 0x11d   : > { %1606 = vmatprep.subr.bf16.mxu0 %v1728_v20  ;;  %1594 = vmatprep.subr.bf16.mxu1 %v1728_v20 }
 0x11f   : > { %1513 = vmatmul.mubr.msk.f32.vlgmr.msra.gmra.mrb[2].mxu0 %vm687_vm7, %v1913_v13 }
 0x120   : > { %1608 = vmatpush3.bf16.msra.mxu0 %v1607_v12  ;;  %1534 = vmatprep.mubr.msk.f32.mxu0 %vm1729_vm2, %v1730_v23 }
 0x121   : > { %1609 = vmatprep.subr.bf16.mxu0 %v1728_v20 }
 0x124   : > { %1611 = vmatpush3.bf16.msra.mxu0 %v1610_v18 }
 0x125   : > { %1618 = vmatprep.subr.bf16.mxu0 %v1728_v20 }
 0x127   : > { %1535 = vmatmul.mubr.msk.f32.vlgmr.msra.gmra.mrb[4].mxu0 %vm411_vm3, %v1880_v25  ;;  %v399_v25 = vld [vmem:[%s2028_s1 + $0x8] sm:$0xff] }
 0x128   : > { %1556 = vmatprep.mubr.msk.f32.mxu0 %vm1729_vm2, %v1730_v23 }
 0x1ee   : > { %v481_v33 = vpop.f32.mrb[0].mxu0 }
 0x1ef   : > { %v482_v34 = vadd.f32 %v1403_v31, %v481_v33  ;;  %v1496_v35 = vpop.f32.mrb[1].mxu0  ;;  %v1619_v31 = vpack.c.bf16 %v1088_v27, %v1087_v26  ;;  %v610_v33 = vld [vmem:[#allocation3 + $0x60] sm:$0xff] }
 0x1f1   : > { %v494_v36 = vrot.slane %v482_v34, %v493_v32  ;;  %v611_v34 = vld [vmem:[#allocation3 + $0x68] sm:$0xff]  ;;  %1620 = vmatpush3.bf16.msra.mxu0 %v1619_v31 }
 0x1f2   : > { %v1595_v35 = vpack.c.bf16 %v611_v34, %v610_v33  ;;  %1621 = vmatprep.subr.bf16.mxu0 %v1728_v20  ;;  %v757_v4 = vpop.f32.mrb[2].mxu0 }
 0x1f3   : > { %v495_v38 = vcombine.high %v494_v36, %v494_v36  ;;  %v502_v39 = vrot.slane %v494_v36, %v493_v32  ;;  %v1089_v36 = vld [vmem:[#allocation3 + $0x100] sm:$0xff]  ;;  %v1514_v5 = vpop.f32.mrb[3].mxu0 }
 0x1f4   : > { %1596 = vmatpush3.bf16.msra.mxu1 %v1595_v35 }
 0x1f5   : > { %v509_v41 = vrot.slane %v495_v38, %v493_v32  ;;  %v513_v42 = vrot.slane %v502_v39, %v1894_v37  ;;  %v1090_v38 = vld [vmem:[#allocation3 + $0x108] sm:$0xff]  ;;  %1600 = vmatprep.subr.bf16.mxu1 %v1728_v20 }
 0x1f7   : > { %v517_v44 = vrot.slane %v509_v41, %v1894_v37  ;;  %v520_v45 = vadd.f32 %v513_v42, %v485_v40  ;;  %v1622_v40 = vpack.c.bf16 %v1090_v38, %v1089_v36  ;;  %v398_v41 = vld [vmem:[%s2028_s1] sm:$0xff]  ;;  %v878_v38 = vld [vmem:[#allocation3 + $0x98] sm:$0xff] }
 0x1f8   : > { %v877_v36 = vld [vmem:[#allocation3 + $0x90] sm:$0xff] }
 0x1f9   : > { %v521_v46 = vadd.f32 %v517_v44, %v486_v43  ;;  %1661 = vtanh.f32 %v520_v45  ;;  %1623 = vmatpush3.bf16.msra.mxu0 %v1622_v40  ;;  %v880_v40 = vld [vmem:[#allocation3 + $0xa8] sm:$0xff] }
 0x1fa   : > { %1630 = vmatprep.subr.bf16.mxu0 %v1728_v20 }
 0x1fb   : > { %1663 = vtanh.f32 %v521_v46 }
 0x203   : > { %v1662_v48 = vpop.eup %1661 }
 0x204   : > { %v529_v49 = vmul.f32 %v1662_v48, %v1405_v47 }
 0x205   : > { %v1664_v50 = vpop.eup %1663 }
 0x206   : > { %531 = vadd.xlane.f32.xlu0 %v529_v49  ;;  %v530_v51 = vmul.f32 %v1664_v50, %v1405_v47 }
 0x20a   : > { %533 = vadd.xlane.f32.xlu0 %v530_v51 }
 0x293   : > { %v532_v53 = vpop.xlane.xlu0 %531 }
 0x294   : > { %v544_v57 = vrot.slane %v532_v53, %v543_v54 }
 0x297   : > { %v534_v56 = vpop.xlane.xlu0 %533 }
 0x298   : > { %v548_v58 = vrot.slane %v534_v56, %v543_v54  ;;  %v761_v56 = vld [vmem:[#allocation3 + $0x70] sm:$0xff] }
 0x29a   : > { %v550_v59 = vsel %vm549_vm4, %v548_v58, %v544_v57  ;;  %v762_v57 = vld [vmem:[#allocation3 + $0x78] sm:$0xff] }
 0x29b   : > { %v552_v60 = vsel %vm536_vm5, %v550_v59, -1e+10 }
 0x29c   : > { %v554_v61 = vsel %vm553_vm6, %v552_v60, -inf }
 0x29d   : > { %555 = vmax.xlane.f32.xlu1 %v554_v61 }
 0x32a   : > { %v556_v62 = vpop.xlane.xlu1 %555 }
 0x32b   : > { %v557_v63 = vsub.f32 %v552_v60, %v556_v62  ;;  %v1601_v62 = vpack.c.bf16 %v762_v57, %v761_v56 }
 0x32d   : > { %v558_v0 = vmul.f32 1.442695, %v557_v63  ;;  %v763_v63 = vld [vmem:[#allocation3 + $0x80] sm:$0xff] }
 0x32f   : > { %1665 = vpow2.f32 %v558_v0  ;;  %v764_v0 = vld [vmem:[#allocation3 + $0x88] sm:$0xff] }
 0x339   : > { %v1666_v1 = vpop.eup %1665 }
 0x33a   : > { %v560_v2 = vsel %vm553_vm6, %v1666_v1, 0.0 }
 0x33b   : > { %561 = vadd.xlane.f32.xlu1 %v560_v2  ;;  %v1604_v2 = vpack.c.bf16 %v764_v0, %v763_v63  ;;  %v1084_v63 = vld [vmem:[#allocation3 + $0xd8] sm:$0xff]  ;;  %v1085_v0 = vld [vmem:[#allocation3 + $0xe0] sm:$0xff] }
 0x3c8   : > { %v562_v6 = vpop.xlane.xlu1 %561 }
 0x3c9   : > { %1667 = vrcp.f32 %v562_v6 }
 0x3d3   : > { %v1668_v7 = vpop.eup %1667 }
 0x3d4   : > { %v564_v8 = vmul.f32 %v1668_v7, %v562_v6 }
 0x3d6   : > { %v565_v11 = vsub.f32 2.0, %v564_v8 }
 0x3d8   : > { %v566_v14 = vmul.f32 %v1668_v7, %v565_v11 }
 0x3da   : > { %v567_v17 = vmul.f32 %v566_v14, %v562_v6  ;;  %v951_v6 = vpop.f32.mrb[4].mxu0 }
 0x3db   : > { %v1536_v7 = vpop.f32.mrb[5].mxu0 }
 0x3dc   : > { %v568_v19 = vsub.f32 2.0, %v567_v17 }
 0x3de   : > { %v569_v28 = vmul.f32 %v568_v19, %v566_v14 }
 0x3e0   : > { %v570_v32 = vmul.f32 %v1666_v1, %v569_v28 }
 0x3e2   : > { %v581_v30 = vrot.slane %v570_v32, %v580_v29  ;;  %1424 = vst.msk [vmem:[%s1831_s29 + $0x2] sm:$0x3] %vm553_vm6, %v570_v32  ;;  %v574_v39 = vrot.slane %v570_v32, %v1894_v37  ;;  %v1406_v29 = vld [vmem:[%s2034_s7 + $0x4] sm:$0x3] }
 0x3e4   : > { %583 = vbcast.lane.b32.xlu1 %v581_v30, 256  ;;  %576 = vbcast.lane.b32.xlu0 %v574_v39, 256  ;;  %v879_v30 = vld [vmem:[#allocation3 + $0xa0] sm:$0xff]  ;;  %v1613_v39 = vpack.c.bf16 %v878_v38, %v877_v36 }
 0x456   : > { %v584_v37 = vpop.permute.xlu1 %583  ;;  %v577_v42 = vpop.permute.xlu0 %576 }
 0x457   : > { %v586_v43 = vmul.f32 %v584_v37, %v399_v25  ;;  %v585_v44 = vmul.f32 %v577_v42, %v398_v41  ;;  %v1616_v25 = vpack.c.bf16 %v880_v40, %v879_v30 }
 0x459   : > { %v594_v45 = vsel %vm411_vm3, %v586_v43, 0.0  ;;  %v587_v46 = vsel %vm411_vm3, %v585_v44, 0.0  ;;  %v1407_v43 = vld [vmem:[%s2034_s7 + $0x6] sm:$0x3] }
 0x45a   : > { %v595_v47 = vrot.slane %v594_v45, 4  ;;  %v588_v48 = vrot.slane %v587_v46, 4 }
 0x45c   : > { %v596_v49 = vadd.f32 %v595_v47, %v594_v45  ;;  %v589_v50 = vadd.f32 %v588_v48, %v587_v46  ;;  %v1415_v46 = vld [vmem:[%s2032_s5 + $0x4] ss:$0 sm:$0xff] }
 0x45e   : > { %v597_v51 = vrot.slane %v596_v49, 2  ;;  %v590_v53 = vrot.slane %v589_v50, 2 }
 0x460   : > { %v598_v54 = vadd.f32 %v597_v51, %v596_v49  ;;  %v591_v55 = vadd.f32 %v590_v53, %v589_v50 }
 0x462   : > { %v599_v58 = vrot.slane %v598_v54, 1  ;;  %v592_v59 = vrot.slane %v591_v55, 1 }
 0x464   : > { %v600_v60 = vadd.f32 %v599_v58, %v598_v54  ;;  %v593_v61 = vadd.f32 %v592_v59, %v591_v55 }
 0x466   : > { %v614_v1 = vsel %vm549_vm4, %v600_v60, %v593_v61 }
 0x467   : > { %1506 = vmatmul.mubr.msk.f32.vlgmr.msra.gmra.mrb[0].mxu1 %vm411_vm3, %v614_v1  ;;  %1557 = vmatmul.mubr.msk.f32.vlgmr.msra.gmra.mrb[6].mxu0 %vm411_vm3, %v614_v1 }
 0x468   : > { %1602 = vmatpush3.bf16.msra.mxu1 %v1601_v62  ;;  %1523 = vmatprep.mubr.msk.f32.mxu1 %vm1729_vm2, %v1730_v23  ;;  %v1083_v62 = vld [vmem:[#allocation3 + $0xd0] sm:$0xff] }
 0x469   : > { %1603 = vmatprep.subr.bf16.mxu1 %v1728_v20  ;;  %1574 = vmatprep.mubr.msk.f32.mxu0 %vm1729_vm2, %v1730_v23  ;;  %v1625_v1 = vpack.c.bf16 %v1084_v63, %v1083_v62 }
 0x46c   : > { %1605 = vmatpush3.bf16.msra.mxu1 %v1604_v2  ;;  %v1086_v2 = vld [vmem:[#allocation3 + $0xe8] sm:$0xff] }
 0x46d   : > { %1612 = vmatprep.subr.bf16.mxu1 %v1728_v20 }
 0x46f   : > { %1524 = vmatmul.mubr.msk.f32.vlgmr.msra.gmra.mrb[2].mxu1 %vm411_vm3, %v601_v3  ;;  %v1233_v3 = vld [vmem:[#allocation3 + $0x110] sm:$0xff] }
 0x470   : > { %1545 = vmatprep.mubr.msk.f32.mxu1 %vm1729_vm2, %v1730_v23  ;;  %1614 = vmatpush3.bf16.msra.mxu1 %v1613_v39 }
 0x471   : > { %1615 = vmatprep.subr.bf16.mxu1 %v1728_v20 }
 0x474   : > { %1617 = vmatpush3.bf16.msra.mxu1 %v1616_v25 }
 0x475   : > { %1624 = vmatprep.subr.bf16.mxu1 %v1728_v20 }
 0x53a   : > { %v683_v8 = vpop.f32.mrb[0].mxu1  ;;  %v1956_v9 = vpop.f32.mrb[6].mxu0 }
 0x53b   : > { %v758_v10 = vadd.f32 %v757_v4, %v683_v8  ;;  %v1507_v11 = vpop.f32.mrb[1].mxu1  ;;  %v1558_v12 = vpop.f32.mrb[7].mxu0  ;;  %v1234_v4 = vld [vmem:[#allocation3 + $0x118] sm:$0xff] }
 0x53c   : > { %v1631_v5 = vpack.c.bf16 %v1234_v4, %v1233_v3 }
 0x53e   : > { %1632 = vmatpush3.bf16.msra.mxu0 %v1631_v5 }
 0x541   : > { %1575 = vmatmul.mubr.msk.f32.vlgmr.msra.gmra.mrb[8].mxu0 %vm687_vm7, %v1913_v13 }
 0x542   : > { %v834_v14 = vpop.f32.mrb[2].mxu1 }
 0x543   : > { %v838_v16 = vadd.f32 %v834_v14, %v758_v10  ;;  %v1525_v17 = vpop.f32.mrb[3].mxu1 }
 0x545   : > { %v844_v18 = vadd.f32 %v1411_v15, %v838_v16 }
 0x547   : > { %v1412_v19 = vmul.f32 -1.442695, %v844_v18 }
 0x549   : > { %1669 = vpow2.f32 %v1412_v19 }
 0x54a   : > { %1671 = vtanh.f32 %v844_v18  ;;  %v1423_v18 = vld [vmem:[%s2032_s5 + $0x5] ss:$0 sm:$0xff] }
 0x553   : > { %v1670_v21 = vpop.eup %1669 }
 0x554   : > { %v852_v22 = vadd.f32 1.0, %v1670_v21  ;;  %v1672_v26 = vpop.eup %1671 }
 0x556   : > { %1673 = vrcp.f32 %v852_v22 }
 0x560   : > { %v1674_v27 = vpop.eup %1673 }
 0x561   : > { %v855_v28 = vsel %vm1963_vm10, %v1672_v26, %v1674_v27 }
 0x562   : > { %862 = vrot.lane.b32.xlu1 %v855_v28, %s1732_s23 }
 0x566   : > { %857 = vrot.lane.b32.xlu1 %v1406_v29, %s1733_s30 }
 0x5d4   : > { %v863_v52 = vpop.permute.xlu1 %862 }
 0x5d5   : > { %v865_v31 = vmul.f32 %v863_v52, %v855_v28 }
 0x5d7   : > { %867 = vrot.lane.b32.xlu0 %v865_v31, %s1733_s30 }
 0x5d8   : > { %v858_v32 = vpop.permute.xlu1 %857 }
 0x5d9   : > { %v860_v33 = vmul.f32 %v858_v32, %v855_v28 }
 0x614   : > { %v1301_v12 = vpop.f32.mrb[8].mxu0 }
 0x615   : > { %v1576_v14 = vpop.f32.mrb[9].mxu0 }
 0x649   : > { %v868_v34 = vpop.permute.xlu0 %867 }
 0x64a   : > { %v1975_v35 = vadd.f32 %v868_v34, %v860_v33 }
 0x64c   : > { %1675 = vtanh.f32 %v1975_v35 }
 0x656   : > { %v1676_v41 = vpop.eup %1675 }
 0x657   : > { %873 = vrot.lane.b32.xlu1 %v1676_v41, %s1732_s23 }
 0x6c9   : > { %v874_v37 = vpop.permute.xlu1 %873 }
 0x6ca   : > { %v876_v42 = vmul.f32 %v874_v37, %v855_v28 }
 0x6cc   : > { %956 = vrot.lane.b32.xlu0 %v876_v42, %s1733_s30 }
 0x6d0   : > { %1045 = vrot.lane.b32.xlu0 %v1407_v43, %s1733_s30 }
 0x73e   : > { %v957_v44 = vpop.permute.xlu0 %956 }
 0x73f   : > { %1067 = vst.msk [vmem:[%s2034_s7] sm:$0x3] %vm1066_vm11, %v957_v44  ;;  %1546 = vmatmul.mubr.msk.f32.vlgmr.msra.gmra.mrb[4].mxu1 %vm411_vm3, %v957_v44 }
 0x740   : > { %1567 = vmatprep.mubr.msk.f32.mxu1 %vm1729_vm2, %v1730_v23  ;;  %1626 = vmatpush3.bf16.msra.mxu1 %v1625_v1 }
 0x741   : > { %1627 = vmatprep.subr.bf16.mxu1 %v1728_v20 }
 0x742   : > { %v1046_v58 = vpop.permute.xlu0 %1045 }
 0x812   : > { %v1026_v45 = vpop.f32.mrb[4].mxu1 }
 0x813   : > { %v1027_v47 = vadd.f32 %v1026_v45, %v951_v6  ;;  %v1547_v48 = vpop.f32.mrb[5].mxu1  ;;  %v1628_v6 = vpack.c.bf16 %v1086_v2, %v1085_v0 }
 0x815   : > { %v1035_v49 = vadd.f32 %v1415_v46, %v1027_v47  ;;  %1629 = vmatpush3.bf16.msra.mxu1 %v1628_v6 }
 0x817   : > { %v1416_v50 = vmul.f32 -1.442695, %v1035_v49 }
 0x819   : > { %1677 = vpow2.f32 %v1416_v50 }
 0x81a   : > { %1679 = vtanh.f32 %v1035_v49 }
 0x823   : > { %v1678_v51 = vpop.eup %1677 }
 0x824   : > { %v1040_v53 = vadd.f32 1.0, %v1678_v51  ;;  %v1680_v54 = vpop.eup %1679 }
 0x826   : > { %1681 = vrcp.f32 %v1040_v53 }
 0x830   : > { %v1682_v55 = vpop.eup %1681 }
 0x831   : > { %v1043_v56 = vsel %vm1963_vm10, %v1680_v54, %v1682_v55 }
 0x832   : > { %1050 = vrot.lane.b32.xlu1 %v1043_v56, %s1732_s23  ;;  %v1048_v59 = vmul.f32 %v1046_v58, %v1043_v56 }
 0x8a4   : > { %v1051_v23 = vpop.permute.xlu1 %1050 }
 0x8a5   : > { %v1053_v57 = vmul.f32 %v1051_v23, %v1043_v56 }
 0x8a7   : > { %1055 = vrot.lane.b32.xlu1 %v1053_v57, %s1733_s30 }
 0x919   : > { %v1056_v60 = vpop.permute.xlu1 %1055 }
 0x91a   : > { %v1058_v61 = vadd.f32 %v1056_v60, %v1048_v59 }
 0x91c   : > { %1683 = vtanh.f32 %v1058_v61 }
 0x926   : > { %v1684_v7 = vpop.eup %1683 }
 0x927   : > { %1061 = vrot.lane.b32.xlu0 %v1684_v7, %s1732_s23 }
 0x92b   : > { %1074 = vrot.lane.b32.xlu0 %v1975_v35, %s1734_s14 }
 0x999   : > { %v1062_v8 = vpop.permute.xlu0 %1061 }
 0x99a   : > { %v1064_v10 = vmul.f32 %v1062_v8, %v1043_v56 }
 0x99c   : > { %1069 = vrot.lane.b32.xlu1 %v1064_v10, %s1733_s30 }
 0x99d   : > { %v1075_v11 = vpop.permute.xlu0 %1074 }
 0x99e   : > { %1418 = vst.msk [vmem:[%s2034_s7 + $0x4] sm:$0x3] %vm1066_vm11, %v1075_v11 }
 0x9a0   : > { %1079 = vrot.lane.b32.xlu1 %v1058_v61, %s1734_s14 }
 0xa0e   : > { %v1070_v20 = vpop.permute.xlu1 %1069 }
 0xa0f   : > { %1417 = vst.msk [vmem:[%s2034_s7 + $0x2] sm:$0x3] %vm1066_vm11, %v1070_v20  ;;  %1568 = vmatmul.mubr.msk.f32.vlgmr.msra.gmra.mrb[6].mxu1 %vm411_vm3, %v1070_v20 }
 0xa12   : > { %v1080_v13 = vpop.permute.xlu1 %1079 }
 0xa13   : > { %1419 = vst.msk [vmem:[%s2034_s7 + $0x6] sm:$0x3] %vm1066_vm11, %v1080_v13 }
 0xae2   : > { %v1229_v15 = vpop.f32.mrb[6].mxu1 }
 0xae3   : > { %v1230_v16 = vadd.f32 %v1229_v15, %v1956_v9  ;;  %v1569_v17 = vpop.f32.mrb[7].mxu1 }
 0xae5   : > { %v1305_v19 = vadd.f32 %v1301_v12, %v1230_v16 }
 0xae7   : > { %v1311_v21 = vadd.f32 %v1423_v18, %v1305_v19 }
 0xae9   : > { %1312 = vst [vmem:[%s1831_s29] sm:$0x3] %v1311_v21 }
 0xaea PF: > { %s19_s24 = sadd.s32 1, %s1723_s24  }
 0xaeb   : > { %p16_p4 = scmp.ge.s32.totalorder %s19_s24, 10  }
 0xaed   :  { %18 = sbr.rel (!%p16_p4) target bundleno = 1 (0x1), region = 95 }
 0xaf4   :  { %1342 = vsyncpa [#allocation4], 1 }
 0xaf5   :  { %1344 = vsyncpa [#allocation4 + $0x1], 1 }

</bundles_post_ra>
